<compile_context>
chip_gen: v7x
topology: tpu7x:2x2x1
jax: 0.10.0
libtpu: 0.0.40
codegen_flags: <defaults>
</compile_context>

<pallas_src>
import functools

import jax
import jax.numpy as jnp
from jax.experimental import pallas as pl
from jax.experimental.pallas import tpu as pltpu


# ----------------------------------------------------------------------------
# Fused kernel: encoders (GAP folded into the weights) + L2 norm + logits
# ----------------------------------------------------------------------------
def _fused_kernel(inv_temp, n_views,
                  xq_ref, xk_ref, wq_ref, wk_ref, bq_ref, bk_ref, queue_ref,
                  k_ref, pos_ref, neg_ref):
    # q branch: (N, C*HW) @ (C*HW, D) + b  -> L2 row-normalize (F.normalize eps=1e-12)
    fq = jnp.dot(xq_ref[...], wq_ref[...],
                 preferred_element_type=jnp.float32) + bq_ref[...]
    q = fq * jax.lax.rsqrt(
        jnp.maximum(jnp.sum(fq * fq, axis=-1, keepdims=True), 1e-24))

    # key branch: all n_views views batched in one matmul (4N, C*HW) @ (C*HW, D)
    fk = jnp.dot(xk_ref[...], wk_ref[...],
                 preferred_element_type=jnp.float32) + bk_ref[...]
    keys = fk * jax.lax.rsqrt(
        jnp.maximum(jnp.sum(fk * fk, axis=-1, keepdims=True), 1e-24))

    n = q.shape[0]
    k_ref[...] = keys[0:n]                     # unrotated key k, for the queue update

    # positive dots: pos[j, i] = q[i] . keys[j*N + i]   (j = 0..n_views-1)
    keys4 = jnp.stack([keys[j * n:(j + 1) * n] for j in range(n_views)], axis=0)
    pos_ref[...] = jnp.sum(q[None, :, :] * keys4, axis=-1) * inv_temp       # (4, N)

    # negatives: q @ queue (queue is the pre-update buffer, like .clone().detach())
    neg_ref[...] = jnp.dot(q, queue_ref[...],
                           preferred_element_type=jnp.float32) * inv_temp   # (N, qlen)


def _fused_pallas(xq, xk, wq_big, wk_big, b_q, b_k, queue, temp):
    n = xq.shape[0]
    d = wq_big.shape[1]
    qlen = queue.shape[1]
    n_views = xk.shape[0] // n
    vmem = pl.BlockSpec(memory_space=pltpu.MemorySpace.VMEM)
    kernel = functools.partial(_fused_kernel, float(1.0 / temp), n_views)
    return pl.pallas_call(
        kernel,
        out_shape=(jax.ShapeDtypeStruct((n, d), jnp.float32),          # k
                   jax.ShapeDtypeStruct((n_views, n), jnp.float32),    # pos dots
                   jax.ShapeDtypeStruct((n, qlen), jnp.float32)),      # l_neg
        in_specs=[vmem] * 7,
        out_specs=(vmem, vmem, vmem),
    )(xq, xk, wq_big, wk_big, b_q.reshape(1, d), b_k.reshape(1, d), queue)


# ----------------------------------------------------------------------------
# Jitted functional forward (state is a dict, donated for in-place queue update)
# ----------------------------------------------------------------------------
def _make_forward(temp, qlen):
    def fwd(state, im_1, im_2, flag, m, mode):
        n, c, h, w = im_1.shape
        hw = h * w

        # momentum (EMA) update of encoder_k, done before encoding keys (as in torch)
        w_k_t = state['w_k_t'] * m + state['w_q_t'] * (1.0 - m)
        b_k = state['b_k'] * m + state['b_q'] * (1.0 - m)

        # fold GAP into the projection weight:  W_big[c*HW + hw, d] = W[c, d] / HW
        wq_big = jnp.repeat(state['w_q_t'] * (1.0 / hw), hw, axis=0)
        wk_big = jnp.repeat(w_k_t * (1.0 / hw), hw, axis=0)

        xq = im_1.reshape(n, c * hw)
        # 4 key views: im_2 and rot90(im_2, r) for r=1..3 (GAP is rotation-invariant
        # for this synthetic encoder, but keep the rotated views for fidelity with
        # the reference's separate encoder_k calls).
        views = jnp.stack(
            [im_2] + [jnp.rot90(im_2, r, axes=(2, 3)) for r in range(1, 4)], axis=0)
        xk = views.reshape(4 * n, c * hw)

        k, pos_t, l_neg = _fused_pallas(xq, xk, wq_big, wk_big,
                                        state['b_q'], b_k, state['queue'], temp)
        pos = pos_t.T                                 # (N, 4): [k, t0, t1, t2], /temp

        if mode == 'moco':
            logits = jnp.concatenate([pos[:, 0:1], l_neg], axis=1)
        else:
            logits = jnp.concatenate([pos[:, 0:1], l_neg, pos[:, 1:4]], axis=1)

        # labels / one-hot targets
        # TODO(synk): torch uses int64 labels and float64 one-hot; TPU uses int32/float32.
        labels = jnp.zeros((n,), dtype=jnp.int32)
        ncls = logits.shape[1]
        one_hot = jax.nn.one_hot(labels, ncls, dtype=jnp.float32)
        posi = jnp.zeros((ncls,), jnp.float32).at[0].set(0.25).at[-3:].set(0.25)
        one_hot = jnp.where((flag == 1)[:, None], posi[None, :], one_hot)

        # queue ring-buffer update (dequeue & enqueue); uses pre-update queue above
        # TODO(synk): DDP concat_all_gather / _batch_shuffle_ddp have no single-chip
        # Pallas equivalent; with world_size==1 they reduce to identity.
        ptr = state['queue_ptr']
        queue = jax.lax.dynamic_update_slice(
            state['queue'], k.T, (jnp.array(0, jnp.int32), ptr))
        new_ptr = ((ptr + n) % qlen).astype(jnp.int32)

        new_state = dict(state, w_k_t=w_k_t, b_k=b_k, queue=queue, queue_ptr=new_ptr)
        return logits, one_hot, labels, new_state

    return jax.jit(fwd, static_argnames=('mode',), donate_argnames=('state',))


# ----------------------------------------------------------------------------
# Builder (functional port of the PyTorch module's forward)
# ----------------------------------------------------------------------------
class BuilderPallas:
    def __init__(self, dim=32, qlen=64, emam=0.999, temp=0.2, in_channels=4,
                 key=jax.random.PRNGKey(0)):
        self.qlen = qlen
        self.emam = emam
        self.temp = temp
        kw, kq = jax.random.split(key, 2)
        # encoder_q.fc : Linear(in_channels -> dim); stored transposed (C, D)
        w_q_t = (jax.random.normal(kw, (in_channels, dim), jnp.float32)
                 * (1.0 / jnp.sqrt(in_channels)))
        b_q = jnp.zeros((dim,), jnp.float32)
        # queue buffer: randn(dim, qlen) normalized along dim=0
        queue = jax.random.normal(kq, (dim, qlen), jnp.float32)
        queue = queue / jnp.linalg.norm(queue, axis=0, keepdims=True)
        self.state = dict(
            w_q_t=w_q_t, b_q=b_q,
            w_k_t=jnp.copy(w_q_t), b_k=jnp.copy(b_q),   # encoder_k = copy of encoder_q
            queue=queue, queue_ptr=jnp.zeros((), jnp.int32))
        self._fwd = _make_forward(temp, qlen)

    @property
    def queue(self):
        return self.state['queue']

    def forward(self, mode, im_1, im_2, flag, m=None):
        bsz = im_1.shape[0]
        assert self.qlen % bsz == 0, 'set qlen % batch_size == 0 for simplicity'
        if m is None:
            m = self.emam
        logits, one_hot, labels, new_state = self._fwd(
            self.state, im_1, im_2, flag, jnp.asarray(m, jnp.float32), mode=mode)
        self.state = new_state
        loss = None
        return logits, one_hot, labels, loss


# ----------------------------------------------------------------------------
if __name__ == "__main__":
    key = jax.random.PRNGKey(0)
    k_params, k_im1, k_im2, k_flag = jax.random.split(key, 4)

    N, C, H, W = 8, 4, 16, 16
    dim, qlen = 32, 64

    builder = BuilderPallas(dim=dim, qlen=qlen, emam=0.999, temp=0.2,
                            in_channels=C, key=k_params)

    im_1 = jax.random.normal(k_im1, (N, C, H, W), jnp.float32)
    im_2 = jax.random.normal(k_im2, (N, C, H, W), jnp.float32)
    flag = (jax.random.uniform(k_flag, (N,)) > 0.5).astype(jnp.int32)

    logits, one_hot_labels, labels, loss = builder.forward('pnda', im_1, im_2, flag)
    jax.block_until_ready((logits, one_hot_labels, labels, builder.queue))

    assert logits.shape == (N, 1 + qlen + 3)
    assert one_hot_labels.shape == (N, 1 + qlen + 3)
    assert labels.shape == (N,)
    assert loss is None
    print("KERNEL_OK")
</pallas_src>

<mosaic_0001>
module attributes {stable_mosaic.version = 11 : i64} {
  func.func @_fused_kernel(%arg0: memref<8x1024xf32, #tpu.memory_space<vmem>>, %arg1: memref<32x1024xf32, #tpu.memory_space<vmem>>, %arg2: memref<1024x32xf32, #tpu.memory_space<vmem>>, %arg3: memref<1024x32xf32, #tpu.memory_space<vmem>>, %arg4: memref<1x32xf32, #tpu.memory_space<vmem>>, %arg5: memref<1x32xf32, #tpu.memory_space<vmem>>, %arg6: memref<32x64xf32, #tpu.memory_space<vmem>>, %arg7: memref<8x32xf32, #tpu.memory_space<vmem>>, %arg8: memref<4x8xf32, #tpu.memory_space<vmem>>, %arg9: memref<8x64xf32, #tpu.memory_space<vmem>>) attributes {dimension_semantics = [], scalar_prefetch = 0 : i64, scratch_operands = 0 : i64, tpu.core_type = #tpu.core_type<tc>} {
    %c0 = arith.constant 0 : index
    %c0_0 = arith.constant 0 : index
    %0 = vector.load %arg0[%c0, %c0_0] : memref<8x1024xf32, #tpu.memory_space<vmem>>, vector<8x1024xf32>
    %c0_1 = arith.constant 0 : index
    %c0_2 = arith.constant 0 : index
    %1 = vector.load %arg2[%c0_1, %c0_2] : memref<1024x32xf32, #tpu.memory_space<vmem>>, vector<1024x32xf32>
    %cst = arith.constant dense<0.000000e+00> : vector<8x32xf32>
    %2 = tpu.matmul %0, %1, %cst {dimension_numbers = #tpu.dot_dimension_numbers<[1], [0], [0], [1], [0, 0, 1, 1], [], []>} : vector<8x1024xf32>, vector<1024x32xf32>, vector<8x32xf32> -> vector<8x32xf32>
    %c0_3 = arith.constant 0 : index
    %c0_4 = arith.constant 0 : index
    %3 = vector.load %arg4[%c0_3, %c0_4] : memref<1x32xf32, #tpu.memory_space<vmem>>, vector<1x32xf32>
    %4 = vector.broadcast %3 : vector<1x32xf32> to vector<8x32xf32>
    %5 = arith.addf %2, %4 : vector<8x32xf32>
    %6 = arith.mulf %5, %5 : vector<8x32xf32>
    %cst_5 = arith.constant dense<0.000000e+00> : vector<8xf32>
    %7 = vector.multi_reduction <add>, %6, %cst_5 [1] : vector<8x32xf32> to vector<8xf32>
    %8 = vector.shape_cast %7 : vector<8xf32> to vector<8x1xf32>
    %cst_6 = arith.constant 1.000000e-24 : f32
    %9 = vector.broadcast %cst_6 : f32 to vector<8x1xf32>
    %10 = arith.maximumf %8, %9 : vector<8x1xf32>
    %11 = math.rsqrt %10 : vector<8x1xf32>
    %12 = vector.broadcast %11 : vector<8x1xf32> to vector<8x32xf32>
    %13 = arith.mulf %5, %12 : vector<8x32xf32>
    %c0_7 = arith.constant 0 : index
    %c0_8 = arith.constant 0 : index
    %14 = vector.load %arg1[%c0_7, %c0_8] : memref<32x1024xf32, #tpu.memory_space<vmem>>, vector<32x1024xf32>
    %c0_9 = arith.constant 0 : index
    %c0_10 = arith.constant 0 : index
    %15 = vector.load %arg3[%c0_9, %c0_10] : memref<1024x32xf32, #tpu.memory_space<vmem>>, vector<1024x32xf32>
    %cst_11 = arith.constant dense<0.000000e+00> : vector<32x32xf32>
    %16 = tpu.matmul %14, %15, %cst_11 {dimension_numbers = #tpu.dot_dimension_numbers<[1], [0], [0], [1], [0, 0, 1, 1], [], []>} : vector<32x1024xf32>, vector<1024x32xf32>, vector<32x32xf32> -> vector<32x32xf32>
    %c0_12 = arith.constant 0 : index
    %c0_13 = arith.constant 0 : index
    %17 = vector.load %arg5[%c0_12, %c0_13] : memref<1x32xf32, #tpu.memory_space<vmem>>, vector<1x32xf32>
    %18 = vector.broadcast %17 : vector<1x32xf32> to vector<32x32xf32>
    %19 = arith.addf %16, %18 : vector<32x32xf32>
    %20 = arith.mulf %19, %19 : vector<32x32xf32>
    %cst_14 = arith.constant dense<0.000000e+00> : vector<32xf32>
    %21 = vector.multi_reduction <add>, %20, %cst_14 [1] : vector<32x32xf32> to vector<32xf32>
    %22 = vector.shape_cast %21 : vector<32xf32> to vector<32x1xf32>
    %cst_15 = arith.constant 1.000000e-24 : f32
    %23 = vector.broadcast %cst_15 : f32 to vector<32x1xf32>
    %24 = arith.maximumf %22, %23 : vector<32x1xf32>
    %25 = math.rsqrt %24 : vector<32x1xf32>
    %26 = vector.broadcast %25 : vector<32x1xf32> to vector<32x32xf32>
    %27 = arith.mulf %19, %26 : vector<32x32xf32>
    %28 = vector.extract_strided_slice %27 {offsets = [0, 0], sizes = [8, 32], strides = [1, 1]} : vector<32x32xf32> to vector<8x32xf32>
    %c0_16 = arith.constant 0 : index
    %c0_17 = arith.constant 0 : index
    %29 = vector.load %arg7[%c0_16, %c0_17] : memref<8x32xf32, #tpu.memory_space<vmem>>, vector<8x32xf32>
    tpu.vector_store %arg7[%c0_16, %c0_17], %28 {strides = array<i32>} : memref<8x32xf32, #tpu.memory_space<vmem>>, vector<8x32xf32>,
    %30 = vector.extract_strided_slice %27 {offsets = [0, 0], sizes = [8, 32], strides = [1, 1]} : vector<32x32xf32> to vector<8x32xf32>
    %31 = vector.extract_strided_slice %27 {offsets = [8, 0], sizes = [8, 32], strides = [1, 1]} : vector<32x32xf32> to vector<8x32xf32>
    %32 = vector.extract_strided_slice %27 {offsets = [16, 0], sizes = [8, 32], strides = [1, 1]} : vector<32x32xf32> to vector<8x32xf32>
    %33 = vector.extract_strided_slice %27 {offsets = [24, 0], sizes = [8, 32], strides = [1, 1]} : vector<32x32xf32> to vector<8x32xf32>
    %34 = vector.shape_cast %30 : vector<8x32xf32> to vector<1x8x32xf32>
    %35 = vector.shape_cast %31 : vector<8x32xf32> to vector<1x8x32xf32>
    %36 = vector.shape_cast %32 : vector<8x32xf32> to vector<1x8x32xf32>
    %37 = vector.shape_cast %33 : vector<8x32xf32> to vector<1x8x32xf32>
    %38 = tpu.concatenate %34, %35, %36, %37 in 0 : vector<1x8x32xf32>, vector<1x8x32xf32>, vector<1x8x32xf32>, vector<1x8x32xf32> -> vector<4x8x32xf32>
    %39 = vector.shape_cast %13 : vector<8x32xf32> to vector<1x8x32xf32>
    %40 = vector.broadcast %39 : vector<1x8x32xf32> to vector<4x8x32xf32>
    %41 = arith.mulf %40, %38 : vector<4x8x32xf32>
    %cst_18 = arith.constant dense<0.000000e+00> : vector<4x8xf32>
    %42 = vector.multi_reduction <add>, %41, %cst_18 [2] : vector<4x8x32xf32> to vector<4x8xf32>
    %cst_19 = arith.constant 5.000000e+00 : f32
    %43 = vector.broadcast %cst_19 : f32 to vector<4x8xf32>
    %44 = arith.mulf %42, %43 : vector<4x8xf32>
    %c0_20 = arith.constant 0 : index
    %c0_21 = arith.constant 0 : index
    %45 = vector.load %arg8[%c0_20, %c0_21] : memref<4x8xf32, #tpu.memory_space<vmem>>, vector<4x8xf32>
    tpu.vector_store %arg8[%c0_20, %c0_21], %44 {strides = array<i32>} : memref<4x8xf32, #tpu.memory_space<vmem>>, vector<4x8xf32>,
    %c0_22 = arith.constant 0 : index
    %c0_23 = arith.constant 0 : index
    %46 = vector.load %arg6[%c0_22, %c0_23] : memref<32x64xf32, #tpu.memory_space<vmem>>, vector<32x64xf32>
    %cst_24 = arith.constant dense<0.000000e+00> : vector<8x64xf32>
    %47 = tpu.matmul %13, %46, %cst_24 {dimension_numbers = #tpu.dot_dimension_numbers<[1], [0], [0], [1], [0, 0, 1, 1], [], []>} : vector<8x32xf32>, vector<32x64xf32>, vector<8x64xf32> -> vector<8x64xf32>
    %cst_25 = arith.constant 5.000000e+00 : f32
    %48 = vector.broadcast %cst_25 : f32 to vector<8x64xf32>
    %49 = arith.mulf %47, %48 : vector<8x64xf32>
    %c0_26 = arith.constant 0 : index
    %c0_27 = arith.constant 0 : index
    %50 = vector.load %arg9[%c0_26, %c0_27] : memref<8x64xf32, #tpu.memory_space<vmem>>, vector<8x64xf32>
    tpu.vector_store %arg9[%c0_26, %c0_27], %49 {strides = array<i32>} : memref<8x64xf32, #tpu.memory_space<vmem>>, vector<8x64xf32>,
    return
  }
}

</mosaic_0001>

<bundles_post_ra>
// kernel: fwd.1
= control target key start
LH: loop header
LB: loop body
LE: loop exit
PB: predicated region body
PF: predicated region fallthrough
CT: control target
= control target key end

     0   :  { %vm453_vm0 = vcmask 261120   ;;  %vm1750_vm1 = vmmov 0   ;;  %vm1125_vm2 = vcmask 523264   ;;  %vm1038_vm3 = vcmask 1041409   ;;  %s2733_s2 = inlined_call_operand.vmem [shape: f32[1024,32], index: 2, kind: input, shape index: {}]   ;;  %s2734_s0 = inlined_call_operand.vmem [shape: f32[8,1024], index: 0, kind: input, shape index: {}]   ;;  %s2735_s3 = inlined_call_operand.vmem [shape: f32[1024,32], index: 3, kind: input, shape index: {}]   ;;  %s2736_s1 = inlined_call_operand.vmem [shape: f32[32,1024], index: 1, kind: input, shape index: {}]   ;;  %s2737_s4 = inlined_call_operand.vmem [shape: f32[1,32], index: 4, kind: input, shape index: {}]   ;;  %s2738_s6 = inlined_call_operand.vmem [shape: f32[32,64], index: 6, kind: input, shape index: {}]   ;;  %s2739_s5 = inlined_call_operand.vmem [shape: f32[1,32], index: 5, kind: input, shape index: {}]   ;;  %s2740_s7 = inlined_call_operand.vmem [shape: f32[8,32], index: 7, kind: output, shape index: {0}]   ;;  %s2741_s9 = inlined_call_operand.vmem [shape: f32[8,64], index: 9, kind: output, shape index: {2}]   ;;  %s2742_s8 = inlined_call_operand.vmem [shape: f32[4,8], index: 8, kind: output, shape index: {1}]  }
   0x1   :  { %v53_v0 = vld [vmem:[%s2733_s2 + $0x80] sm:$0xff]  ;;  %v54_v1 = vld [vmem:[%s2733_s2 + $0x88] sm:$0xff]  ;;  %v55_v11 = vld [vmem:[%s2733_s2 + $0x90] sm:$0xff]  ;;  %vm1040_vm4 = vcmask 1042434   ;;  %vm1042_vm5 = vcmask 1043459   ;;  %vm1045_vm6 = vcmask 60416  }
   0x2   :  { %v37_v2 = vld [vmem:[%s2733_s2] sm:$0xff]  ;;  %v1474_v3 = vpack.c.bf16 %v54_v1, %v53_v0  ;;  %v38_v4 = vld [vmem:[%s2733_s2 + $0x8] sm:$0xff]  ;;  %v56_v13 = vld [vmem:[%s2733_s2 + $0x98] sm:$0xff] }
   0x3   :  { %v85_v5 = vld [vmem:[%s2733_s2 + $0x180] sm:$0xff]  ;;  %v86_v6 = vld [vmem:[%s2733_s2 + $0x188] sm:$0xff]  ;;  %v1476_v7 = vpack.c.bf16 %v38_v4, %v37_v2  ;;  %v39_v14 = vld [vmem:[%s2733_s2 + $0x10] sm:$0xff]  ;;  %v1478_v16 = vpack.c.bf16 %v56_v13, %v55_v11 }
   0x4   :  { %v1506_v8 = vpack.c.bf16 %v86_v6, %v85_v5  ;;  %v69_v9 = vld [vmem:[%s2733_s2 + $0x100] sm:$0xff]  ;;  %v70_v10 = vld [vmem:[%s2733_s2 + $0x108] sm:$0xff]  ;;  %1475 = vmatprep.subr.bf16.mxu0 %v1474_v3  ;;  %v40_v15 = vld [vmem:[%s2733_s2 + $0x18] sm:$0xff] }
   0x5   :  { %v1508_v12 = vpack.c.bf16 %v70_v10, %v69_v9  ;;  %1477 = vmatpush3.bf16.msra.mxu0 %v1476_v7  ;;  %v1480_v17 = vpack.c.bf16 %v40_v15, %v39_v14  ;;  %v87_v18 = vld [vmem:[%s2733_s2 + $0x190] sm:$0xff]  ;;  %v88_v19 = vld [vmem:[%s2733_s2 + $0x198] sm:$0xff]  ;;  %v57_v23 = vld [vmem:[%s2733_s2 + $0xa0] sm:$0xff] }
   0x6   :  { %1507 = vmatprep.subr.bf16.mxu1 %v1506_v8  ;;  %v71_v20 = vld [vmem:[%s2733_s2 + $0x110] sm:$0xff]  ;;  %v1510_v21 = vpack.c.bf16 %v88_v19, %v87_v18  ;;  %v72_v22 = vld [vmem:[%s2733_s2 + $0x118] sm:$0xff]  ;;  %v58_v24 = vld [vmem:[%s2733_s2 + $0xa8] sm:$0xff]  ;;  %1479 = vmatprep.subr.bf16.mxu0 %v1478_v16 }
   0x7   :  { %1509 = vmatpush3.bf16.msra.mxu1 %v1508_v12  ;;  %v1512_v25 = vpack.c.bf16 %v72_v22, %v71_v20  ;;  %v1482_v26 = vpack.c.bf16 %v58_v24, %v57_v23  ;;  %v41_v27 = vld [vmem:[%s2733_s2 + $0x20] sm:$0xff]  ;;  %v42_v28 = vld [vmem:[%s2733_s2 + $0x28] sm:$0xff]  ;;  %v59_v35 = vld [vmem:[%s2733_s2 + $0xb0] sm:$0xff] }
   0x8   :  { %v89_v29 = vld [vmem:[%s2733_s2 + $0x1a0] sm:$0xff]  ;;  %1511 = vmatprep.subr.bf16.mxu1 %v1510_v21  ;;  %v90_v30 = vld [vmem:[%s2733_s2 + $0x1a8] sm:$0xff]  ;;  %v1484_v33 = vpack.c.bf16 %v42_v28, %v41_v27  ;;  %v60_v36 = vld [vmem:[%s2733_s2 + $0xb8] sm:$0xff] }
   0x9   :  { %v73_v31 = vld [vmem:[%s2733_s2 + $0x120] sm:$0xff]  ;;  %v74_v32 = vld [vmem:[%s2733_s2 + $0x128] sm:$0xff]  ;;  %1481 = vmatpush3.bf16.msra.mxu0 %v1480_v17  ;;  %v1514_v34 = vpack.c.bf16 %v90_v30, %v89_v29  ;;  %v43_v37 = vld [vmem:[%s2733_s2 + $0x30] sm:$0xff]  ;;  %v1486_v39 = vpack.c.bf16 %v60_v36, %v59_v35 }
   0xa   :  { %1483 = vmatprep.subr.bf16.mxu0 %v1482_v26  ;;  %v1516_v38 = vpack.c.bf16 %v74_v32, %v73_v31  ;;  %v44_v40 = vld [vmem:[%s2733_s2 + $0x38] sm:$0xff]  ;;  %v91_v41 = vld [vmem:[%s2733_s2 + $0x1b0] sm:$0xff]  ;;  %v61_v46 = vld [vmem:[%s2733_s2 + $0xc0] sm:$0xff] }
   0xb   :  { %1513 = vmatpush3.bf16.msra.mxu1 %v1512_v25  ;;  %v92_v42 = vld [vmem:[%s2733_s2 + $0x1b8] sm:$0xff]  ;;  %v75_v44 = vld [vmem:[%s2733_s2 + $0x130] sm:$0xff]  ;;  %v62_v47 = vld [vmem:[%s2733_s2 + $0xc8] sm:$0xff]  ;;  %v1488_v48 = vpack.c.bf16 %v44_v40, %v43_v37 }
   0xc   :  { %1515 = vmatprep.subr.bf16.mxu1 %v1514_v34  ;;  %v1518_v43 = vpack.c.bf16 %v92_v42, %v91_v41  ;;  %v76_v45 = vld [vmem:[%s2733_s2 + $0x138] sm:$0xff]  ;;  %v93_v49 = vld [vmem:[%s2733_s2 + $0x1c0] sm:$0xff]  ;;  %v94_v50 = vld [vmem:[%s2733_s2 + $0x1c8] sm:$0xff]  ;;  %v1490_v52 = vpack.c.bf16 %v62_v47, %v61_v46 }
   0xd   :  { %1485 = vmatpush3.bf16.msra.mxu0 %v1484_v33  ;;  %v1520_v51 = vpack.c.bf16 %v76_v45, %v75_v44  ;;  %v45_v53 = vld [vmem:[%s2733_s2 + $0x40] sm:$0xff]  ;;  %v46_v54 = vld [vmem:[%s2733_s2 + $0x48] sm:$0xff]  ;;  %v1522_v56 = vpack.c.bf16 %v94_v50, %v93_v49  ;;  %v63_v58 = vld [vmem:[%s2733_s2 + $0xd0] sm:$0xff] }
   0xe   :  { %1487 = vmatprep.subr.bf16.mxu0 %v1486_v39  ;;  %v77_v55 = vld [vmem:[%s2733_s2 + $0x140] sm:$0xff]  ;;  %v78_v57 = vld [vmem:[%s2733_s2 + $0x148] sm:$0xff]  ;;  %v64_v59 = vld [vmem:[%s2733_s2 + $0xd8] sm:$0xff]  ;;  %v1492_v62 = vpack.c.bf16 %v46_v54, %v45_v53 }
   0xf   :  { %1517 = vmatpush3.bf16.msra.mxu1 %v1516_v38  ;;  %v95_v60 = vld [vmem:[%s2733_s2 + $0x1d0] sm:$0xff]  ;;  %v96_v61 = vld [vmem:[%s2733_s2 + $0x1d8] sm:$0xff]  ;;  %v1524_v63 = vpack.c.bf16 %v78_v57, %v77_v55  ;;  %v1494_v0 = vpack.c.bf16 %v64_v59, %v63_v58  ;;  %v65_v6 = vld [vmem:[%s2733_s2 + $0xe0] sm:$0xff] }
  0x10   :  { %1519 = vmatprep.subr.bf16.mxu1 %v1518_v43  ;;  %v47_v1 = vld [vmem:[%s2733_s2 + $0x50] sm:$0xff]  ;;  %v48_v2 = vld [vmem:[%s2733_s2 + $0x58] sm:$0xff]  ;;  %v1526_v4 = vpack.c.bf16 %v96_v61, %v95_v60  ;;  %v66_v7 = vld [vmem:[%s2733_s2 + $0xe8] sm:$0xff] }
  0x11   :  { %1489 = vmatpush3.bf16.msra.mxu0 %v1488_v48  ;;  %v79_v3 = vld [vmem:[%s2733_s2 + $0x150] sm:$0xff]  ;;  %v80_v5 = vld [vmem:[%s2733_s2 + $0x158] sm:$0xff]  ;;  %v97_v8 = vld [vmem:[%s2733_s2 + $0x1e0] sm:$0xff]  ;;  %v1496_v10 = vpack.c.bf16 %v48_v2, %v47_v1  ;;  %v1498_v14 = vpack.c.bf16 %v66_v7, %v65_v6 }
  0x12   :  { %1491 = vmatprep.subr.bf16.mxu0 %v1490_v52  ;;  %v98_v9 = vld [vmem:[%s2733_s2 + $0x1e8] sm:$0xff]  ;;  %v49_v11 = vld [vmem:[%s2733_s2 + $0x60] sm:$0xff]  ;;  %v1528_v13 = vpack.c.bf16 %v80_v5, %v79_v3  ;;  %v67_v19 = vld [vmem:[%s2733_s2 + $0xf0] sm:$0xff] }
  0x13   :  { %1521 = vmatpush3.bf16.msra.mxu1 %v1520_v51  ;;  %v50_v12 = vld [vmem:[%s2733_s2 + $0x68] sm:$0xff]  ;;  %v81_v15 = vld [vmem:[%s2733_s2 + $0x160] sm:$0xff]  ;;  %v1530_v18 = vpack.c.bf16 %v98_v9, %v97_v8  ;;  %v68_v20 = vld [vmem:[%s2733_s2 + $0xf8] sm:$0xff] }
  0x14   :  { %1523 = vmatprep.subr.bf16.mxu1 %v1522_v56  ;;  %v82_v16 = vld [vmem:[%s2733_s2 + $0x168] sm:$0xff]  ;;  %v32_v21 = vld [vmem:[%s2734_s0 + $0x18] sm:$0xff]  ;;  %v99_v22 = vld [vmem:[%s2733_s2 + $0x1f0] sm:$0xff]  ;;  %v1500_v24 = vpack.c.bf16 %v50_v12, %v49_v11  ;;  %v1502_v26 = vpack.c.bf16 %v68_v20, %v67_v19 }
  0x15   :  { %1493 = vmatpush3.bf16.msra.mxu0 %v1492_v62  ;;  %v30_v17 = vld [vmem:[%s2734_s0 + $0x8] sm:$0xff]  ;;  %v100_v23 = vld [vmem:[%s2733_s2 + $0x1f8] sm:$0xff]  ;;  %306 = vmatprep.mubr.f32.mxu1 %v32_v21  ;;  %v1532_v25 = vpack.c.bf16 %v82_v16, %v81_v15  ;;  %v51_v27 = vld [vmem:[%s2733_s2 + $0x70] sm:$0xff] }
  0x16   :  { %1495 = vmatprep.subr.bf16.mxu0 %v1494_v0  ;;  %236 = vmatprep.mubr.f32.mxu0 %v30_v17  ;;  %v52_v28 = vld [vmem:[%s2733_s2 + $0x78] sm:$0xff]  ;;  %v83_v29 = vld [vmem:[%s2733_s2 + $0x170] sm:$0xff]  ;;  %v1534_v30 = vpack.c.bf16 %v100_v23, %v99_v22  ;;  %v117_v32 = vld [vmem:[%s2733_s2 + $0x280] sm:$0xff] }
  0x17   :  { %1525 = vmatpush3.bf16.msra.mxu1 %v1524_v63  ;;  %v84_v31 = vld [vmem:[%s2733_s2 + $0x178] sm:$0xff]  ;;  %v118_v33 = vld [vmem:[%s2733_s2 + $0x288] sm:$0xff]  ;;  %v149_v34 = vld [vmem:[%s2733_s2 + $0x380] sm:$0xff]  ;;  %v1504_v36 = vpack.c.bf16 %v52_v28, %v51_v27 }
  0x18   :  { %1527 = vmatprep.subr.bf16.mxu1 %v1526_v4  ;;  %v150_v35 = vld [vmem:[%s2733_s2 + $0x388] sm:$0xff]  ;;  %v1536_v37 = vpack.c.bf16 %v84_v31, %v83_v29  ;;  %v1538_v38 = vpack.c.bf16 %v118_v33, %v117_v32  ;;  %v101_v39 = vld [vmem:[%s2733_s2 + $0x200] sm:$0xff]  ;;  %v119_v44 = vld [vmem:[%s2733_s2 + $0x290] sm:$0xff] }
  0x19   :  { %1497 = vmatpush3.bf16.msra.mxu0 %v1496_v10  ;;  %v102_v40 = vld [vmem:[%s2733_s2 + $0x208] sm:$0xff]  ;;  %v133_v41 = vld [vmem:[%s2733_s2 + $0x300] sm:$0xff]  ;;  %v1570_v42 = vpack.c.bf16 %v150_v35, %v149_v34  ;;  %v120_v45 = vld [vmem:[%s2733_s2 + $0x298] sm:$0xff] }
  0x1a   :  { %1499 = vmatprep.subr.bf16.mxu0 %v1498_v14  ;;  %v134_v43 = vld [vmem:[%s2733_s2 + $0x308] sm:$0xff]  ;;  %v151_v46 = vld [vmem:[%s2733_s2 + $0x390] sm:$0xff]  ;;  %v152_v47 = vld [vmem:[%s2733_s2 + $0x398] sm:$0xff]  ;;  %v1540_v49 = vpack.c.bf16 %v102_v40, %v101_v39  ;;  %v1542_v52 = vpack.c.bf16 %v120_v45, %v119_v44 }
  0x1b   :  { %1529 = vmatpush3.bf16.msra.mxu1 %v1528_v13  ;;  %v29_v48 = vld [vmem:[%s2734_s0] sm:$0xff]  ;;  %v31_v50 = vld [vmem:[%s2734_s0 + $0x10] sm:$0xff]  ;;  %v1572_v51 = vpack.c.bf16 %v134_v43, %v133_v41  ;;  %v104_v54 = vld [vmem:[%s2733_s2 + $0x218] sm:$0xff]  ;;  %v1574_v56 = vpack.c.bf16 %v152_v47, %v151_v46 }
  0x1c   :  { %1531 = vmatprep.subr.bf16.mxu1 %v1530_v18  ;;  %v103_v53 = vld [vmem:[%s2733_s2 + $0x210] sm:$0xff]  ;;  %v136_v57 = vld [vmem:[%s2733_s2 + $0x318] sm:$0xff]  ;;  %v121_v58 = vld [vmem:[%s2733_s2 + $0x2a0] sm:$0xff] }
  0x1d   :  { %1501 = vmatpush3.bf16.msra.mxu0 %v1500_v24  ;;  %v135_v55 = vld [vmem:[%s2733_s2 + $0x310] sm:$0xff]  ;;  %v122_v59 = vld [vmem:[%s2733_s2 + $0x2a8] sm:$0xff]  ;;  %v153_v60 = vld [vmem:[%s2733_s2 + $0x3a0] sm:$0xff]  ;;  %v1544_v62 = vpack.c.bf16 %v104_v54, %v103_v53 }
  0x1e   :  { %1503 = vmatprep.subr.bf16.mxu0 %v1502_v26  ;;  %v154_v61 = vld [vmem:[%s2733_s2 + $0x3a8] sm:$0xff]  ;;  %v1576_v63 = vpack.c.bf16 %v136_v57, %v135_v55  ;;  %v1546_v0 = vpack.c.bf16 %v122_v59, %v121_v58  ;;  %v105_v1 = vld [vmem:[%s2733_s2 + $0x220] sm:$0xff]  ;;  %v123_v6 = vld [vmem:[%s2733_s2 + $0x2b0] sm:$0xff] }
  0x1f   :  { %1533 = vmatpush3.bf16.msra.mxu1 %v1532_v25  ;;  %v106_v2 = vld [vmem:[%s2733_s2 + $0x228] sm:$0xff]  ;;  %v137_v3 = vld [vmem:[%s2733_s2 + $0x320] sm:$0xff]  ;;  %v1578_v4 = vpack.c.bf16 %v154_v61, %v153_v60  ;;  %v124_v7 = vld [vmem:[%s2733_s2 + $0x2b8] sm:$0xff] }
  0x20   :  { %1535 = vmatprep.subr.bf16.mxu1 %v1534_v30  ;;  %v138_v5 = vld [vmem:[%s2733_s2 + $0x328] sm:$0xff]  ;;  %v155_v8 = vld [vmem:[%s2733_s2 + $0x3b0] sm:$0xff]  ;;  %v156_v9 = vld [vmem:[%s2733_s2 + $0x3b8] sm:$0xff]  ;;  %v1548_v10 = vpack.c.bf16 %v106_v2, %v105_v1  ;;  %v1550_v12 = vpack.c.bf16 %v124_v7, %v123_v6 }
  0x21   :  { %1505 = vmatpush3.bf16.msra.mxu0 %v1504_v36  ;;  %v1580_v11 = vpack.c.bf16 %v138_v5, %v137_v3  ;;  %v107_v13 = vld [vmem:[%s2733_s2 + $0x230] sm:$0xff]  ;;  %v108_v14 = vld [vmem:[%s2733_s2 + $0x238] sm:$0xff]  ;;  %v1582_v16 = vpack.c.bf16 %v156_v9, %v155_v8  ;;  %v125_v18 = vld [vmem:[%s2733_s2 + $0x2c0] sm:$0xff] }
  0x22   :  { %1539 = vmatprep.subr.bf16.mxu0 %v1538_v38  ;;  %v139_v15 = vld [vmem:[%s2733_s2 + $0x330] sm:$0xff]  ;;  %v140_v17 = vld [vmem:[%s2733_s2 + $0x338] sm:$0xff]  ;;  %v126_v19 = vld [vmem:[%s2733_s2 + $0x2c8] sm:$0xff]  ;;  %v1552_v22 = vpack.c.bf16 %v108_v14, %v107_v13 }
  0x23   :  { %1537 = vmatpush3.bf16.msra.mxu1 %v1536_v37  ;;  %v157_v20 = vld [vmem:[%s2733_s2 + $0x3c0] sm:$0xff]  ;;  %v158_v21 = vld [vmem:[%s2733_s2 + $0x3c8] sm:$0xff]  ;;  %v1584_v25 = vpack.c.bf16 %v140_v17, %v139_v15  ;;  %v1554_v26 = vpack.c.bf16 %v126_v19, %v125_v18  ;;  %v36_v29 = vld [vmem:[%s2734_s0 + $0x38] sm:$0xff] }
  0x24   :  { %1571 = vmatprep.subr.bf16.mxu1 %v1570_v42  ;;  %237 = vmatmul.mubr.f32.vlgmr.msra.gmra.mrb[0].mxu0 %v29_v48  ;;  %v109_v23 = vld [vmem:[%s2733_s2 + $0x240] sm:$0xff]  ;;  %v34_v24 = vld [vmem:[%s2734_s0 + $0x28] sm:$0xff]  ;;  %v1586_v30 = vpack.c.bf16 %v158_v21, %v157_v20  ;;  %v127_v32 = vld [vmem:[%s2733_s2 + $0x2d0] sm:$0xff] }
  0x25   :  { %1541 = vmatpush3.bf16.msra.mxu0 %v1540_v49  ;;  %v110_v27 = vld [vmem:[%s2733_s2 + $0x248] sm:$0xff]  ;;  %v141_v28 = vld [vmem:[%s2733_s2 + $0x340] sm:$0xff]  ;;  %v128_v33 = vld [vmem:[%s2733_s2 + $0x2d8] sm:$0xff]  ;;  %376 = vmatprep.mubr.f32.mxu0 %v34_v24 }
  0x26   :  { %307 = vmatmul.mubr.f32.vlgmr.msra.gmra.mrb[0].mxu1 %v31_v50  ;;  %1543 = vmatprep.subr.bf16.mxu0 %v1542_v52  ;;  %v142_v31 = vld [vmem:[%s2733_s2 + $0x348] sm:$0xff]  ;;  %v159_v34 = vld [vmem:[%s2733_s2 + $0x3d0] sm:$0xff]  ;;  %v160_v35 = vld [vmem:[%s2733_s2 + $0x3d8] sm:$0xff]  ;;  %v1556_v36 = vpack.c.bf16 %v110_v27, %v109_v23  ;;  %v1558_v38 = vpack.c.bf16 %v128_v33, %v127_v32 }
  0x27   :  { %1573 = vmatpush3.bf16.msra.mxu1 %v1572_v51  ;;  %446 = vmatprep.mubr.f32.mxu1 %v36_v29  ;;  %v1588_v37 = vpack.c.bf16 %v142_v31, %v141_v28  ;;  %v111_v39 = vld [vmem:[%s2733_s2 + $0x250] sm:$0xff]  ;;  %v112_v40 = vld [vmem:[%s2733_s2 + $0x258] sm:$0xff]  ;;  %v1590_v42 = vpack.c.bf16 %v160_v35, %v159_v34  ;;  %v129_v44 = vld [vmem:[%s2733_s2 + $0x2e0] sm:$0xff] }
  0x28   :  { %1575 = vmatprep.subr.bf16.mxu1 %v1574_v56  ;;  %v143_v41 = vld [vmem:[%s2733_s2 + $0x350] sm:$0xff]  ;;  %v144_v43 = vld [vmem:[%s2733_s2 + $0x358] sm:$0xff]  ;;  %v130_v45 = vld [vmem:[%s2733_s2 + $0x2e8] sm:$0xff]  ;;  %v1560_v48 = vpack.c.bf16 %v112_v40, %v111_v39 }
  0x29   :  { %1545 = vmatpush3.bf16.msra.mxu0 %v1544_v62  ;;  %v161_v46 = vld [vmem:[%s2733_s2 + $0x3e0] sm:$0xff]  ;;  %v162_v47 = vld [vmem:[%s2733_s2 + $0x3e8] sm:$0xff]  ;;  %v1592_v49 = vpack.c.bf16 %v144_v43, %v143_v41  ;;  %v1562_v50 = vpack.c.bf16 %v130_v45, %v129_v44  ;;  %v131_v56 = vld [vmem:[%s2733_s2 + $0x2f0] sm:$0xff] }
  0x2a   :  { %1547 = vmatprep.subr.bf16.mxu0 %v1546_v0  ;;  %v113_v51 = vld [vmem:[%s2733_s2 + $0x260] sm:$0xff]  ;;  %v114_v52 = vld [vmem:[%s2733_s2 + $0x268] sm:$0xff]  ;;  %v1594_v54 = vpack.c.bf16 %v162_v47, %v161_v46  ;;  %v132_v57 = vld [vmem:[%s2733_s2 + $0x2f8] sm:$0xff] }
  0x2b   :  { %1577 = vmatpush3.bf16.msra.mxu1 %v1576_v63  ;;  %v145_v53 = vld [vmem:[%s2733_s2 + $0x360] sm:$0xff]  ;;  %v146_v55 = vld [vmem:[%s2733_s2 + $0x368] sm:$0xff]  ;;  %v163_v58 = vld [vmem:[%s2733_s2 + $0x3f0] sm:$0xff]  ;;  %v1564_v60 = vpack.c.bf16 %v114_v52, %v113_v51  ;;  %v1566_v62 = vpack.c.bf16 %v132_v57, %v131_v56 }
  0x2c   :  { %1579 = vmatprep.subr.bf16.mxu1 %v1578_v4  ;;  %v164_v59 = vld [vmem:[%s2733_s2 + $0x3f8] sm:$0xff]  ;;  %v1596_v61 = vpack.c.bf16 %v146_v55, %v145_v53  ;;  %v115_v63 = vld [vmem:[%s2733_s2 + $0x270] sm:$0xff]  ;;  %v508_v4 = vld [vmem:[%s2735_s3 + $0x80] sm:$0xff] }
  0x2d   :  { %1549 = vmatpush3.bf16.msra.mxu0 %v1548_v10  ;;  %v116_v0 = vld [vmem:[%s2733_s2 + $0x278] sm:$0xff]  ;;  %v147_v1 = vld [vmem:[%s2733_s2 + $0x370] sm:$0xff]  ;;  %v1598_v2 = vpack.c.bf16 %v164_v59, %v163_v58  ;;  %v509_v5 = vld [vmem:[%s2735_s3 + $0x88] sm:$0xff] }
  0x2e   :  { %1551 = vmatprep.subr.bf16.mxu0 %v1550_v12  ;;  %v148_v3 = vld [vmem:[%s2733_s2 + $0x378] sm:$0xff]  ;;  %v540_v6 = vld [vmem:[%s2735_s3 + $0x180] sm:$0xff]  ;;  %v541_v7 = vld [vmem:[%s2735_s3 + $0x188] sm:$0xff]  ;;  %v1568_v8 = vpack.c.bf16 %v116_v0, %v115_v63  ;;  %v1602_v10 = vpack.c.bf16 %v509_v5, %v508_v4 }
  0x2f   :  { %1581 = vmatpush3.bf16.msra.mxu1 %v1580_v11  ;;  %v1600_v9 = vpack.c.bf16 %v148_v3, %v147_v1  ;;  %v492_v11 = vld [vmem:[%s2735_s3] sm:$0xff]  ;;  %v493_v12 = vld [vmem:[%s2735_s3 + $0x8] sm:$0xff]  ;;  %v1634_v14 = vpack.c.bf16 %v541_v7, %v540_v6  ;;  %v511_v17 = vld [vmem:[%s2735_s3 + $0x98] sm:$0xff] }
  0x30   :  { %1583 = vmatprep.subr.bf16.mxu1 %v1582_v16  ;;  %v524_v13 = vld [vmem:[%s2735_s3 + $0x100] sm:$0xff]  ;;  %v525_v15 = vld [vmem:[%s2735_s3 + $0x108] sm:$0xff]  ;;  %v510_v16 = vld [vmem:[%s2735_s3 + $0x90] sm:$0xff]  ;;  %v1604_v21 = vpack.c.bf16 %v493_v12, %v492_v11 }
  0x31   :  { %1553 = vmatpush3.bf16.msra.mxu0 %v1552_v22  ;;  %v542_v18 = vld [vmem:[%s2735_s3 + $0x190] sm:$0xff]  ;;  %v543_v19 = vld [vmem:[%s2735_s3 + $0x198] sm:$0xff]  ;;  %v33_v20 = vld [vmem:[%s2734_s0 + $0x20] sm:$0xff]  ;;  %v1636_v23 = vpack.c.bf16 %v525_v15, %v524_v13  ;;  %v1606_v24 = vpack.c.bf16 %v511_v17, %v510_v16 }
  0x32   :  { %1555 = vmatprep.subr.bf16.mxu0 %v1554_v26  ;;  %v35_v22 = vld [vmem:[%s2734_s0 + $0x30] sm:$0xff]  ;;  %v495_v26 = vld [vmem:[%s2735_s3 + $0x18] sm:$0xff]  ;;  %v1638_v28 = vpack.c.bf16 %v543_v19, %v542_v18  ;;  %v513_v31 = vld [vmem:[%s2735_s3 + $0xa8] sm:$0xff] }
  0x33   :  { %1585 = vmatpush3.bf16.msra.mxu1 %v1584_v25  ;;  %v494_v25 = vld [vmem:[%s2735_s3 + $0x10] sm:$0xff]  ;;  %v527_v29 = vld [vmem:[%s2735_s3 + $0x118] sm:$0xff]  ;;  %v544_v32 = vld [vmem:[%s2735_s3 + $0x1a0] sm:$0xff] }
  0x34   :  { %1587 = vmatprep.subr.bf16.mxu1 %v1586_v30  ;;  %v526_v27 = vld [vmem:[%s2735_s3 + $0x110] sm:$0xff]  ;;  %v512_v30 = vld [vmem:[%s2735_s3 + $0xa0] sm:$0xff]  ;;  %v545_v33 = vld [vmem:[%s2735_s3 + $0x1a8] sm:$0xff]  ;;  %v1608_v35 = vpack.c.bf16 %v495_v26, %v494_v25 }
  0x35   :  { %1557 = vmatpush3.bf16.msra.mxu0 %v1556_v36  ;;  %v461_v34 = vld [vmem:[%s2736_s1 + $0x8] sm:$0xff]  ;;  %v463_v36 = vld [vmem:[%s2736_s1 + $0x18] sm:$0xff]  ;;  %v496_v39 = vld [vmem:[%s2735_s3 + $0x20] sm:$0xff] }
  0x36   :  { %1559 = vmatprep.subr.bf16.mxu0 %v1558_v38  ;;  %v1610_v38 = vpack.c.bf16 %v513_v31, %v512_v30  ;;  %v497_v40 = vld [vmem:[%s2735_s3 + $0x28] sm:$0xff]  ;;  %v528_v41 = vld [vmem:[%s2735_s3 + $0x120] sm:$0xff]  ;;  %v514_v44 = vld [vmem:[%s2735_s3 + $0xb0] sm:$0xff] }
  0x37   :  { %1589 = vmatpush3.bf16.msra.mxu1 %v1588_v37  ;;  %v1640_v37 = vpack.c.bf16 %v527_v29, %v526_v27  ;;  %v529_v43 = vld [vmem:[%s2735_s3 + $0x128] sm:$0xff]  ;;  %v515_v45 = vld [vmem:[%s2735_s3 + $0xb8] sm:$0xff]  ;;  %v546_v46 = vld [vmem:[%s2735_s3 + $0x1b0] sm:$0xff] }
  0x38   :  { %1591 = vmatprep.subr.bf16.mxu1 %v1590_v42  ;;  %v1642_v42 = vpack.c.bf16 %v545_v33, %v544_v32  ;;  %v547_v47 = vld [vmem:[%s2735_s3 + $0x1b8] sm:$0xff]  ;;  %v498_v51 = vld [vmem:[%s2735_s3 + $0x30] sm:$0xff]  ;;  %v516_v56 = vld [vmem:[%s2735_s3 + $0xc0] sm:$0xff] }
  0x39   :  { %1561 = vmatpush3.bf16.msra.mxu0 %v1560_v48  ;;  %v1612_v48 = vpack.c.bf16 %v497_v40, %v496_v39  ;;  %v499_v52 = vld [vmem:[%s2735_s3 + $0x38] sm:$0xff]  ;;  %v530_v53 = vld [vmem:[%s2735_s3 + $0x130] sm:$0xff]  ;;  %v517_v57 = vld [vmem:[%s2735_s3 + $0xc8] sm:$0xff] }
  0x3a   :  { %1563 = vmatprep.subr.bf16.mxu0 %v1562_v50  ;;  %v1614_v50 = vpack.c.bf16 %v515_v45, %v514_v44  ;;  %v531_v55 = vld [vmem:[%s2735_s3 + $0x138] sm:$0xff]  ;;  %v548_v58 = vld [vmem:[%s2735_s3 + $0x1c0] sm:$0xff]  ;;  %v549_v59 = vld [vmem:[%s2735_s3 + $0x1c8] sm:$0xff] }
  0x3b   :  { %1593 = vmatpush3.bf16.msra.mxu1 %v1592_v49  ;;  %v1644_v49 = vpack.c.bf16 %v529_v43, %v528_v41  ;;  %v500_v63 = vld [vmem:[%s2735_s3 + $0x40] sm:$0xff]  ;;  %v501_v0 = vld [vmem:[%s2735_s3 + $0x48] sm:$0xff]  ;;  %v518_v4 = vld [vmem:[%s2735_s3 + $0xd0] sm:$0xff] }
  0x3c   :  { %1595 = vmatprep.subr.bf16.mxu1 %v1594_v54  ;;  %v1646_v54 = vpack.c.bf16 %v547_v47, %v546_v46  ;;  %v532_v1 = vld [vmem:[%s2735_s3 + $0x140] sm:$0xff]  ;;  %v533_v3 = vld [vmem:[%s2735_s3 + $0x148] sm:$0xff]  ;;  %v519_v5 = vld [vmem:[%s2735_s3 + $0xd8] sm:$0xff] }
  0x3d   :  { %1565 = vmatpush3.bf16.msra.mxu0 %v1564_v60  ;;  %v1616_v60 = vpack.c.bf16 %v499_v52, %v498_v51  ;;  %v550_v6 = vld [vmem:[%s2735_s3 + $0x1d0] sm:$0xff]  ;;  %v551_v7 = vld [vmem:[%s2735_s3 + $0x1d8] sm:$0xff]  ;;  %v520_v16 = vld [vmem:[%s2735_s3 + $0xe0] sm:$0xff] }
  0x3e   :  { %1567 = vmatprep.subr.bf16.mxu0 %v1566_v62  ;;  %v1618_v62 = vpack.c.bf16 %v517_v57, %v516_v56  ;;  %v502_v11 = vld [vmem:[%s2735_s3 + $0x50] sm:$0xff]  ;;  %v503_v12 = vld [vmem:[%s2735_s3 + $0x58] sm:$0xff]  ;;  %v521_v17 = vld [vmem:[%s2735_s3 + $0xe8] sm:$0xff] }
  0x3f   :  { %1597 = vmatpush3.bf16.msra.mxu1 %v1596_v61  ;;  %v1648_v61 = vpack.c.bf16 %v531_v55, %v530_v53  ;;  %v534_v13 = vld [vmem:[%s2735_s3 + $0x150] sm:$0xff]  ;;  %v535_v15 = vld [vmem:[%s2735_s3 + $0x158] sm:$0xff]  ;;  %v552_v18 = vld [vmem:[%s2735_s3 + $0x1e0] sm:$0xff] }
  0x40   :  { %1599 = vmatprep.subr.bf16.mxu1 %v1598_v2  ;;  %v1650_v2 = vpack.c.bf16 %v549_v59, %v548_v58  ;;  %v553_v19 = vld [vmem:[%s2735_s3 + $0x1e8] sm:$0xff]  ;;  %v536_v25 = vld [vmem:[%s2735_s3 + $0x160] sm:$0xff]  ;;  %v523_v29 = vld [vmem:[%s2735_s3 + $0xf8] sm:$0xff] }
  0x41   :  { %1569 = vmatpush3.bf16.msra.mxu0 %v1568_v8  ;;  %v1620_v8 = vpack.c.bf16 %v501_v0, %v500_v63  ;;  %v1658_v26 = vpack.c.bf16 %v553_v19, %v552_v18  ;;  %v537_v27 = vld [vmem:[%s2735_s3 + $0x168] sm:$0xff]  ;;  %v554_v30 = vld [vmem:[%s2735_s3 + $0x1f0] sm:$0xff]  ;;  %v555_v31 = vld [vmem:[%s2735_s3 + $0x1f8] sm:$0xff] }
  0x42   :  { %1603 = vmatprep.subr.bf16.mxu0 %v1602_v10  ;;  %v1622_v10 = vpack.c.bf16 %v519_v5, %v518_v4  ;;  %v1660_v33 = vpack.c.bf16 %v537_v27, %v536_v25  ;;  %v539_v39 = vld [vmem:[%s2735_s3 + $0x178] sm:$0xff]  ;;  %v572_v40 = vld [vmem:[%s2735_s3 + $0x280] sm:$0xff]  ;;  %v573_v41 = vld [vmem:[%s2735_s3 + $0x288] sm:$0xff] }
  0x43   :  { %1601 = vmatpush3.bf16.msra.mxu1 %v1600_v9  ;;  %v1652_v9 = vpack.c.bf16 %v533_v3, %v532_v1  ;;  %v605_v43 = vld [vmem:[%s2735_s3 + $0x388] sm:$0xff]  ;;  %v1666_v46 = vpack.c.bf16 %v573_v41, %v572_v40  ;;  %v556_v47 = vld [vmem:[%s2735_s3 + $0x200] sm:$0xff]  ;;  %v574_v52 = vld [vmem:[%s2735_s3 + $0x290] sm:$0xff] }
  0x44   :  { %1635 = vmatprep.subr.bf16.mxu1 %v1634_v14  ;;  %377 = vmatmul.mubr.f32.vlgmr.msra.gmra.mrb[2].mxu0 %v33_v20  ;;  %v1654_v14 = vpack.c.bf16 %v551_v7, %v550_v6  ;;  %v1624_v20 = vpack.c.bf16 %v503_v12, %v502_v11  ;;  %v589_v51 = vld [vmem:[%s2735_s3 + $0x308] sm:$0xff]  ;;  %v575_v53 = vld [vmem:[%s2735_s3 + $0x298] sm:$0xff]  ;;  %v460_v56 = vld [vmem:[%s2736_s1] sm:$0xff] }
  0x45   :  { %1605 = vmatpush3.bf16.msra.mxu0 %v1604_v21  ;;  %691 = vmatprep.mubr.f32.mxu0 %v461_v34  ;;  %v1656_v21 = vpack.c.bf16 %v535_v15, %v534_v13  ;;  %v607_v55 = vld [vmem:[%s2735_s3 + $0x398] sm:$0xff]  ;;  %v462_v58 = vld [vmem:[%s2736_s1 + $0x10] sm:$0xff]  ;;  %v577_v3 = vld [vmem:[%s2735_s3 + $0x2a8] sm:$0xff] }
  0x46   :  { %447 = vmatmul.mubr.f32.vlgmr.msra.gmra.mrb[2].mxu1 %v35_v22  ;;  %1607 = vmatprep.subr.bf16.mxu0 %v1606_v24  ;;  %v1626_v22 = vpack.c.bf16 %v521_v17, %v520_v16  ;;  %v505_v24 = vld [vmem:[%s2735_s3 + $0x68] sm:$0xff]  ;;  %v590_v63 = vld [vmem:[%s2735_s3 + $0x310] sm:$0xff]  ;;  %v591_v1 = vld [vmem:[%s2735_s3 + $0x318] sm:$0xff] }
  0x47   :  { %1637 = vmatpush3.bf16.msra.mxu1 %v1636_v23  ;;  %776 = vmatprep.mubr.f32.mxu1 %v463_v36  ;;  %v504_v23 = vld [vmem:[%s2735_s3 + $0x60] sm:$0xff]  ;;  %v507_v36 = vld [vmem:[%s2735_s3 + $0x78] sm:$0xff]  ;;  %v609_v5 = vld [vmem:[%s2735_s3 + $0x3a8] sm:$0xff]  ;;  %v1704_v11 = vpack.c.bf16 %v591_v1, %v590_v63 }
  0x48   :  { %1639 = vmatprep.subr.bf16.mxu1 %v1638_v28  ;;  %v522_v28 = vld [vmem:[%s2735_s3 + $0xf0] sm:$0xff]  ;;  %v1628_v32 = vpack.c.bf16 %v505_v24, %v504_v23  ;;  %v608_v4 = vld [vmem:[%s2735_s3 + $0x3a0] sm:$0xff]  ;;  %v469_v6 = vld [vmem:[%s2736_s1 + $0x48] sm:$0xff] }
  0x49   :  { %1609 = vmatpush3.bf16.msra.mxu0 %v1608_v35  ;;  %v1630_v34 = vpack.c.bf16 %v523_v29, %v522_v28  ;;  %v506_v35 = vld [vmem:[%s2735_s3 + $0x70] sm:$0xff]  ;;  %v561_v13 = vld [vmem:[%s2735_s3 + $0x228] sm:$0xff]  ;;  %v1706_v16 = vpack.c.bf16 %v609_v5, %v608_v4  ;;  %v579_v19 = vld [vmem:[%s2735_s3 + $0x2b8] sm:$0xff] }
  0x4a   :  { %1611 = vmatprep.subr.bf16.mxu0 %v1610_v38  ;;  %v1662_v38 = vpack.c.bf16 %v555_v31, %v554_v30  ;;  %v1632_v44 = vpack.c.bf16 %v507_v36, %v506_v35  ;;  %v470_v15 = vld [vmem:[%s2736_s1 + $0x50] sm:$0xff]  ;;  %v593_v17 = vld [vmem:[%s2735_s3 + $0x328] sm:$0xff]  ;;  %v476_v25 = vld [vmem:[%s2736_s1 + $0x80] sm:$0xff] }
  0x4b   :  { %1641 = vmatpush3.bf16.msra.mxu1 %v1640_v37  ;;  %v538_v37 = vld [vmem:[%s2735_s3 + $0x170] sm:$0xff]  ;;  %v563_v29 = vld [vmem:[%s2735_s3 + $0x238] sm:$0xff]  ;;  %v581_v35 = vld [vmem:[%s2735_s3 + $0x2c8] sm:$0xff] }
  0x4c   :  { %1643 = vmatprep.subr.bf16.mxu1 %v1642_v42  ;;  %v604_v42 = vld [vmem:[%s2735_s3 + $0x380] sm:$0xff]  ;;  %v1664_v45 = vpack.c.bf16 %v539_v39, %v538_v37  ;;  %v578_v18 = vld [vmem:[%s2735_s3 + $0x2b0] sm:$0xff]  ;;  %v613_v37 = vld [vmem:[%s2735_s3 + $0x3c8] sm:$0xff] }
  0x4d   :  { %1613 = vmatpush3.bf16.msra.mxu0 %v1612_v48  ;;  %v557_v48 = vld [vmem:[%s2735_s3 + $0x208] sm:$0xff]  ;;  %v562_v24 = vld [vmem:[%s2735_s3 + $0x230] sm:$0xff]  ;;  %v1678_v28 = vpack.c.bf16 %v579_v19, %v578_v18  ;;  %v612_v36 = vld [vmem:[%s2735_s3 + $0x3c0] sm:$0xff] }
  0x4e   :  { %1615 = vmatprep.subr.bf16.mxu0 %v1614_v50  ;;  %v1698_v50 = vpack.c.bf16 %v605_v43, %v604_v42  ;;  %v1668_v57 = vpack.c.bf16 %v557_v48, %v556_v47  ;;  %v594_v30 = vld [vmem:[%s2735_s3 + $0x330] sm:$0xff]  ;;  %v1680_v39 = vpack.c.bf16 %v563_v29, %v562_v24  ;;  %v564_v40 = vld [vmem:[%s2735_s3 + $0x240] sm:$0xff]  ;;  %v487_v42 = vld [vmem:[%s2736_s1 + $0xd8] sm:$0xff]  ;;  %v1714_v48 = vpack.c.bf16 %v613_v37, %v612_v36 }
  0x4f   :  { %1645 = vmatpush3.bf16.msra.mxu1 %v1644_v49  ;;  %v588_v49 = vld [vmem:[%s2735_s3 + $0x300] sm:$0xff]  ;;  %v478_v31 = vld [vmem:[%s2736_s1 + $0x90] sm:$0xff]  ;;  %v599_v63 = vld [vmem:[%s2735_s3 + $0x358] sm:$0xff] }
  0x50   :  { %1647 = vmatprep.subr.bf16.mxu1 %v1646_v54  ;;  %v606_v54 = vld [vmem:[%s2735_s3 + $0x390] sm:$0xff]  ;;  %v1700_v59 = vpack.c.bf16 %v589_v51, %v588_v49  ;;  %v484_v41 = vld [vmem:[%s2736_s1 + $0xc0] sm:$0xff]  ;;  %v597_v49 = vld [vmem:[%s2735_s3 + $0x348] sm:$0xff] }
  0x51   :  { %1617 = vmatpush3.bf16.msra.mxu0 %v1616_v60  ;;  %v1670_v60 = vpack.c.bf16 %v575_v53, %v574_v52  ;;  %v1702_v0 = vpack.c.bf16 %v607_v55, %v606_v54  ;;  %v486_v47 = vld [vmem:[%s2736_s1 + $0xd0] sm:$0xff]  ;;  %v583_v51 = vld [vmem:[%s2735_s3 + $0x2d8] sm:$0xff]  ;;  %v465_v54 = vld [vmem:[%s2736_s1 + $0x28] sm:$0xff] }
  0x52   :  { %1619 = vmatprep.subr.bf16.mxu0 %v1618_v62  ;;  %v559_v62 = vld [vmem:[%s2735_s3 + $0x218] sm:$0xff]  ;;  %v614_v52 = vld [vmem:[%s2735_s3 + $0x3d0] sm:$0xff]  ;;  %v585_v1 = vld [vmem:[%s2735_s3 + $0x2e8] sm:$0xff] }
  0x53   :  { %1649 = vmatpush3.bf16.msra.mxu1 %v1648_v61  ;;  %v558_v61 = vld [vmem:[%s2735_s3 + $0x210] sm:$0xff]  ;;  %v615_v53 = vld [vmem:[%s2735_s3 + $0x3d8] sm:$0xff]  ;;  %v489_v36 = vld [vmem:[%s2736_s1 + $0xe8] sm:$0xff] }
  0x54   :  { %1651 = vmatprep.subr.bf16.mxu1 %v1650_v2  ;;  %v576_v2 = vld [vmem:[%s2735_s3 + $0x2a0] sm:$0xff]  ;;  %v1672_v7 = vpack.c.bf16 %v559_v62, %v558_v61  ;;  %v598_v61 = vld [vmem:[%s2735_s3 + $0x350] sm:$0xff]  ;;  %v1718_v62 = vpack.c.bf16 %v615_v53, %v614_v52  ;;  %v475_v29 = vld [vmem:[%s2736_s1 + $0x78] sm:$0xff] }
  0x55   :  { %1621 = vmatpush3.bf16.msra.mxu0 %v1620_v8  ;;  %v560_v8 = vld [vmem:[%s2735_s3 + $0x220] sm:$0xff]  ;;  %v1674_v12 = vpack.c.bf16 %v577_v3, %v576_v2  ;;  %v617_v3 = vld [vmem:[%s2735_s3 + $0x3e8] sm:$0xff]  ;;  %v1720_v5 = vpack.c.bf16 %v599_v63, %v598_v61  ;;  %v570_v19 = vld [vmem:[%s2735_s3 + $0x270] sm:$0xff]  ;;  %v1749_v63 = vmov 0.0|0.0  }
  0x56   :  { %1623 = vmatprep.subr.bf16.mxu0 %v1622_v10  ;;  %v471_v10 = vld [vmem:[%s2736_s1 + $0x58] sm:$0xff]  ;;  %v1676_v23 = vpack.c.bf16 %v561_v13, %v560_v8  ;;  %v616_v2 = vld [vmem:[%s2735_s3 + $0x3e0] sm:$0xff]  ;;  %v569_v8 = vld [vmem:[%s2735_s3 + $0x268] sm:$0xff] }
  0x57   :  { %1653 = vmatpush3.bf16.msra.mxu1 %v1652_v9  ;;  %v468_v9 = vld [vmem:[%s2736_s1 + $0x40] sm:$0xff]  ;;  %v587_v13 = vld [vmem:[%s2735_s3 + $0x2f8] sm:$0xff] }
  0x58   :  { %1655 = vmatprep.subr.bf16.mxu1 %v1654_v14  ;;  %v592_v14 = vld [vmem:[%s2735_s3 + $0x320] sm:$0xff]  ;;  %v491_v37 = vld [vmem:[%s2736_s1 + $0xf8] sm:$0xff] }
  0x59   :  { %1625 = vmatpush3.bf16.msra.mxu0 %v1624_v20  ;;  %v610_v20 = vld [vmem:[%s2735_s3 + $0x3b0] sm:$0xff]  ;;  %v1708_v27 = vpack.c.bf16 %v593_v17, %v592_v14 }
  0x5a   :  { %1627 = vmatprep.subr.bf16.mxu0 %v1626_v22  ;;  %v477_v22 = vld [vmem:[%s2736_s1 + $0x88] sm:$0xff]  ;;  %v618_v14 = vld [vmem:[%s2735_s3 + $0x3f0] sm:$0xff] }
  0x5b   :  { %1657 = vmatpush3.bf16.msra.mxu1 %v1656_v21  ;;  %v611_v21 = vld [vmem:[%s2735_s3 + $0x3b8] sm:$0xff] }
  0x5c   :  { %1659 = vmatprep.subr.bf16.mxu1 %v1658_v26  ;;  %v479_v26 = vld [vmem:[%s2736_s1 + $0x98] sm:$0xff] }
  0x5d   :  { %1629 = vmatpush3.bf16.msra.mxu0 %v1628_v32  ;;  %v1710_v32 = vpack.c.bf16 %v611_v21, %v610_v20  ;;  %v571_v20 = vld [vmem:[%s2735_s3 + $0x278] sm:$0xff] }
  0x5e   :  { %1631 = vmatprep.subr.bf16.mxu0 %v1630_v34  ;;  %v580_v34 = vld [vmem:[%s2735_s3 + $0x2c0] sm:$0xff]  ;;  %v1696_v24 = vpack.c.bf16 %v571_v20, %v570_v19 }
  0x5f   :  { %1661 = vmatpush3.bf16.msra.mxu1 %v1660_v33  ;;  %v595_v33 = vld [vmem:[%s2735_s3 + $0x338] sm:$0xff] }
  0x60   :  { %1663 = vmatprep.subr.bf16.mxu1 %v1662_v38  ;;  %v485_v38 = vld [vmem:[%s2736_s1 + $0xc8] sm:$0xff]  ;;  %v1712_v43 = vpack.c.bf16 %v595_v33, %v594_v30  ;;  %v472_v30 = vld [vmem:[%s2736_s1 + $0x60] sm:$0xff]  ;;  %v483_v33 = vld [vmem:[%s2736_s1 + $0xb8] sm:$0xff] }
  0x61   :  { %1633 = vmatpush3.bf16.msra.mxu0 %v1632_v44  ;;  %v1682_v44 = vpack.c.bf16 %v581_v35, %v580_v34  ;;  %v480_v34 = vld [vmem:[%s2736_s1 + $0xa0] sm:$0xff]  ;;  %v482_v35 = vld [vmem:[%s2736_s1 + $0xb0] sm:$0xff] }
  0x62   :  { %1667 = vmatprep.subr.bf16.mxu0 %v1666_v46  ;;  %v596_v46 = vld [vmem:[%s2735_s3 + $0x340] sm:$0xff] }
  0x63   :  { %1665 = vmatpush3.bf16.msra.mxu1 %v1664_v45  ;;  %v565_v45 = vld [vmem:[%s2735_s3 + $0x248] sm:$0xff] }
  0x64   :  { %1699 = vmatprep.subr.bf16.mxu1 %v1698_v50  ;;  %692 = vmatmul.mubr.f32.vlgmr.msra.gmra.mrb[4].mxu0 %v460_v56  ;;  %v582_v50 = vld [vmem:[%s2735_s3 + $0x2d0] sm:$0xff]  ;;  %v1684_v55 = vpack.c.bf16 %v565_v45, %v564_v40  ;;  %v467_v56 = vld [vmem:[%s2736_s1 + $0x38] sm:$0xff] }
  0x65   :  { %1669 = vmatpush3.bf16.msra.mxu0 %v1668_v57  ;;  %696 = vmatprep.mubr.f32.mxu0 %v469_v6  ;;  %v1716_v57 = vpack.c.bf16 %v597_v49, %v596_v46 }
  0x66   :  { %777 = vmatmul.mubr.f32.vlgmr.msra.gmra.mrb[4].mxu1 %v462_v58  ;;  %1671 = vmatprep.subr.bf16.mxu0 %v1670_v60  ;;  %v1686_v58 = vpack.c.bf16 %v583_v51, %v582_v50  ;;  %v567_v60 = vld [vmem:[%s2735_s3 + $0x258] sm:$0xff] }
  0x67   :  { %1701 = vmatpush3.bf16.msra.mxu1 %v1700_v59  ;;  %781 = vmatprep.mubr.f32.mxu1 %v471_v10  ;;  %v566_v59 = vld [vmem:[%s2735_s3 + $0x250] sm:$0xff]  ;;  %v1722_v10 = vpack.c.bf16 %v617_v3, %v616_v2 }
  0x68   :  { %1703 = vmatprep.subr.bf16.mxu1 %v1702_v0  ;;  %697 = vmatmul.mubr.f32.gmra.mrb[6].mxu0 %v468_v9  ;;  %v584_v0 = vld [vmem:[%s2735_s3 + $0x2e0] sm:$0xff]  ;;  %v1688_v4 = vpack.c.bf16 %v567_v60, %v566_v59  ;;  %v1048_v60 = vld [vmem:[%s2738_s6 + $0x8] sm:$0xff] }
  0x69   :  { %1673 = vmatpush3.bf16.msra.mxu0 %v1672_v7  ;;  %701 = vmatprep.mubr.f32.mxu0 %v477_v22  ;;  %v1690_v6 = vpack.c.bf16 %v585_v1, %v584_v0  ;;  %v568_v7 = vld [vmem:[%s2735_s3 + $0x260] sm:$0xff]  ;;  %v602_v22 = vld [vmem:[%s2735_s3 + $0x370] sm:$0xff] }
  0x6a   :  { %782 = vmatmul.mubr.f32.gmra.mrb[6].mxu1 %v470_v15  ;;  %1675 = vmatprep.subr.bf16.mxu0 %v1674_v12  ;;  %v600_v9 = vld [vmem:[%s2735_s3 + $0x360] sm:$0xff]  ;;  %v586_v12 = vld [vmem:[%s2735_s3 + $0x2f0] sm:$0xff]  ;;  %v619_v15 = vld [vmem:[%s2735_s3 + $0x3f8] sm:$0xff] }
  0x6b   :  { %1705 = vmatpush3.bf16.msra.mxu1 %v1704_v11  ;;  %786 = vmatprep.mubr.f32.mxu1 %v479_v26  ;;  %v601_v11 = vld [vmem:[%s2735_s3 + $0x368] sm:$0xff]  ;;  %v1694_v18 = vpack.c.bf16 %v587_v13, %v586_v12  ;;  %v1726_v21 = vpack.c.bf16 %v619_v15, %v618_v14  ;;  %v464_v26 = vld [vmem:[%s2736_s1 + $0x20] sm:$0xff] }
  0x6c   :  { %1707 = vmatprep.subr.bf16.mxu1 %v1706_v16  ;;  %702 = vmatmul.mubr.f32.gmra.mrb[8].mxu0 %v476_v25  ;;  %v1692_v16 = vpack.c.bf16 %v569_v8, %v568_v7  ;;  %v1724_v17 = vpack.c.bf16 %v601_v11, %v600_v9  ;;  %v1047_v59 = vld [vmem:[%s2738_s6] sm:$0xff] }
  0x6d   :  { %1677 = vmatpush3.bf16.msra.mxu0 %v1676_v23  ;;  %706 = vmatprep.mubr.f32.mxu0 %v485_v38  ;;  %v603_v23 = vld [vmem:[%s2735_s3 + $0x378] sm:$0xff]  ;;  %v488_v38 = vld [vmem:[%s2736_s1 + $0xe0] sm:$0xff]  ;;  %v1731_v61 = vpack.c.bf16 %v1048_v60, %v1047_v59 }
  0x6e   :  { %787 = vmatmul.mubr.f32.gmra.mrb[8].mxu1 %v478_v31  ;;  %1679 = vmatprep.subr.bf16.mxu0 %v1678_v28  ;;  %v1728_v25 = vpack.c.bf16 %v603_v23, %v602_v22  ;;  %v473_v28 = vld [vmem:[%s2736_s1 + $0x68] sm:$0xff]  ;;  %v474_v31 = vld [vmem:[%s2736_s1 + $0x70] sm:$0xff]  ;;  %v1140_v0 = vld [vmem:[%s2739_s5] ss:$0 sm:$0xff] }
  0x6f   :  { %1709 = vmatpush3.bf16.msra.mxu1 %v1708_v27  ;;  %791 = vmatprep.mubr.f32.mxu1 %v487_v42  ;;  %v466_v27 = vld [vmem:[%s2736_s1 + $0x30] sm:$0xff] }
  0x70   :  { %1711 = vmatprep.subr.bf16.mxu1 %v1710_v32  ;;  %707 = vmatmul.mubr.f32.gmra.mrb[10].mxu0 %v484_v41  ;;  %v481_v32 = vld [vmem:[%s2736_s1 + $0xa8] sm:$0xff]  ;;  %v1139_v41 = vld [vmem:[%s2737_s4] ss:$0 sm:$0xff] }
  0x71   :  { %1681 = vmatpush3.bf16.msra.mxu0 %v1680_v39  ;;  %861 = vmatprep.mubr.f32.mxu0 %v465_v54  ;;  %v490_v39 = vld [vmem:[%s2736_s1 + $0xf0] sm:$0xff] }
  0x72   :  { %792 = vmatmul.mubr.f32.gmra.mrb[10].mxu1 %v486_v47  ;;  %1683 = vmatprep.subr.bf16.mxu0 %v1682_v44 }
  0x73   :  { %1713 = vmatpush3.bf16.msra.mxu1 %v1712_v43  ;;  %946 = vmatprep.mubr.f32.mxu1 %v467_v56 }
  0x74   :  { %1715 = vmatprep.subr.bf16.mxu1 %v1714_v48 }
  0x75   :  { %1685 = vmatpush3.bf16.msra.mxu0 %v1684_v55 }
  0x76   :  { %1687 = vmatprep.subr.bf16.mxu0 %v1686_v58 }
  0x77   :  { %1717 = vmatpush3.bf16.msra.mxu1 %v1716_v57 }
  0x78   :  { %1719 = vmatprep.subr.bf16.mxu1 %v1718_v62 }
  0x79   :  { %1689 = vmatpush3.bf16.msra.mxu0 %v1688_v4 }
  0x7a   :  { %1691 = vmatprep.subr.bf16.mxu0 %v1690_v6  ;;  %v1050_v6 = vld [vmem:[%s2738_s6 + $0x18] sm:$0xff] }
  0x7b   :  { %1721 = vmatpush3.bf16.msra.mxu1 %v1720_v5  ;;  %v1049_v5 = vld [vmem:[%s2738_s6 + $0x10] sm:$0xff] }
  0x7c   :  { %1723 = vmatprep.subr.bf16.mxu1 %v1722_v10  ;;  %v1734_v8 = vpack.c.bf16 %v1050_v6, %v1049_v5 }
  0x7d   :  { %1693 = vmatpush3.bf16.msra.mxu0 %v1692_v16 }
  0x7e   :  { %1695 = vmatprep.subr.bf16.mxu0 %v1694_v18 }
  0x7f   :  { %1725 = vmatpush3.bf16.msra.mxu1 %v1724_v17  ;;  %v1751_v17 = vmov 0.0  }
  0x80   :  { %1727 = vmatprep.subr.bf16.mxu1 %v1726_v21 }
  0x81   :  { %1697 = vmatpush3.bf16.msra.mxu0 %v1696_v24 }
  0x82   :  { %1730 = vmatprep.subr.bf16.mxu0 %v1749_v63 }
  0x83   :  { %1729 = vmatpush3.bf16.msra.mxu1 %v1728_v25 }
  0x84   :  { %862 = vmatmul.mubr.f32.vlgmr.msra.gmra.mrb[12].mxu0 %v464_v26 }
  0x85   :  { %866 = vmatprep.mubr.f32.mxu0 %v473_v28  ;;  %1732 = vmatpush3.bf16.msra.mxu0 %v1731_v61 }
  0x86   :  { %947 = vmatmul.mubr.f32.vlgmr.msra.gmra.mrb[12].mxu1 %v466_v27  ;;  %1733 = vmatprep.subr.bf16.mxu0 %v1749_v63 }
  0x87   :  { %951 = vmatprep.mubr.f32.mxu1 %v475_v29 }
  0x88   :  { %867 = vmatmul.mubr.f32.gmra.mrb[14].mxu0 %v472_v30 }
  0x89   :  { %871 = vmatprep.mubr.f32.mxu0 %v481_v32  ;;  %1735 = vmatpush3.bf16.msra.mxu0 %v1734_v8 }
  0x8a   :  { %952 = vmatmul.mubr.f32.gmra.mrb[14].mxu1 %v474_v31 }
  0x8b   :  { %956 = vmatprep.mubr.f32.mxu1 %v483_v33 }
  0x8c   :  { %872 = vmatmul.mubr.f32.gmra.mrb[16].mxu0 %v480_v34 }
  0x8d   :  { %876 = vmatprep.mubr.f32.mxu0 %v489_v36 }
  0x8e   :  { %957 = vmatmul.mubr.f32.gmra.mrb[16].mxu1 %v482_v35 }
  0x8f   :  { %961 = vmatprep.mubr.f32.mxu1 %v491_v37 }
  0x90   :  { %877 = vmatmul.mubr.f32.gmra.mrb[18].mxu0 %v488_v38 }
  0x91   :  { %1471 = vmatprep.mubr.msk.f32.mxu0 %vm1750_vm1, %v1751_v17 }
  0x92   :  { %962 = vmatmul.mubr.f32.gmra.mrb[18].mxu1 %v490_v39 }
  0xf7   :  { %v1174_v40 = vpop.f32.mrb[0].mxu0 }
  0xf8   :  { %v1175_v42 = vpop.f32.mrb[1].mxu0 }
  0xf9   :  { %v1209_v43 = vpop.f32.mrb[0].mxu1  ;;  %v1176_v44 = vadd.f32 %v1175_v42, %v1174_v40 }
  0xfa   :  { %v1210_v45 = vpop.f32.mrb[1].mxu1 }
  0xfb   :  { %v1211_v46 = vadd.f32 %v1210_v45, %v1209_v43  ;;  %v239_v47 = vadd.f32 %v1176_v44, %v1139_v41 }
  0xfd   :  { %v309_v48 = vadd.f32 %v1211_v46, %v239_v47 }
 0x117   :  { %v1244_v49 = vpop.f32.mrb[2].mxu0 }
 0x118   :  { %v1245_v50 = vpop.f32.mrb[3].mxu0 }
 0x119   :  { %v1279_v51 = vpop.f32.mrb[2].mxu1  ;;  %v1246_v52 = vadd.f32 %v1245_v50, %v1244_v49 }
 0x11a   :  { %v1280_v53 = vpop.f32.mrb[3].mxu1 }
 0x11b   :  { %v1281_v54 = vadd.f32 %v1280_v53, %v1279_v51  ;;  %v379_v55 = vadd.f32 %v1246_v52, %v309_v48 }
 0x11d   :  { %v2693_v56 = vadd.f32 %v1281_v54, %v379_v55 }
 0x11f   :  { %v452_v57 = vmul.f32 %v2693_v56, %v2693_v56 }
 0x121   :  { %v454_v58 = vsel %vm453_vm0, %v452_v57, 0.0 }
 0x122   :  { %455 = vadd.xlane.f32.xlu0 %v454_v58 }
 0x137   :  { %v1314_v62 = vpop.f32.mrb[4].mxu0 }
 0x138   :  { %v1315_v1 = vpop.f32.mrb[5].mxu0 }
 0x139   :  { %v1358_v2 = vpop.f32.mrb[4].mxu1  ;;  %v1316_v3 = vadd.f32 %v1315_v1, %v1314_v62 }
 0x13a   :  { %v1359_v4 = vpop.f32.mrb[5].mxu1 }
 0x13b   :  { %v1360_v7 = vadd.f32 %v1359_v4, %v1358_v2  ;;  %v694_v9 = vadd.f32 %v1316_v3, %v1140_v0  ;;  %v1317_v10 = vpop.f32.mrb[6].mxu0 }
 0x13c   :  { %v1318_v11 = vpop.f32.mrb[7].mxu0 }
 0x13d   :  { %v1361_v12 = vpop.f32.mrb[6].mxu1  ;;  %v779_v13 = vadd.f32 %v1360_v7, %v694_v9  ;;  %v1319_v14 = vadd.f32 %v1318_v11, %v1317_v10 }
 0x13e   :  { %v1362_v15 = vpop.f32.mrb[7].mxu1 }
 0x13f   :  { %v1363_v16 = vadd.f32 %v1362_v15, %v1361_v12  ;;  %v699_v18 = vadd.f32 %v1319_v14, %v1140_v0  ;;  %v1320_v19 = vpop.f32.mrb[8].mxu0 }
 0x140   :  { %v1321_v20 = vpop.f32.mrb[9].mxu0 }
 0x141   :  { %v1364_v21 = vpop.f32.mrb[8].mxu1  ;;  %v784_v22 = vadd.f32 %v1363_v16, %v699_v18  ;;  %v1322_v23 = vadd.f32 %v1321_v20, %v1320_v19 }
 0x142   :  { %v1365_v24 = vpop.f32.mrb[9].mxu1 }
 0x143   :  { %v1366_v25 = vadd.f32 %v1365_v24, %v1364_v21  ;;  %v704_v26 = vadd.f32 %v1322_v23, %v1140_v0  ;;  %v1323_v27 = vpop.f32.mrb[10].mxu0 }
 0x144   :  { %v1324_v28 = vpop.f32.mrb[11].mxu0 }
 0x145   :  { %v1367_v29 = vpop.f32.mrb[10].mxu1  ;;  %v789_v30 = vadd.f32 %v1366_v25, %v704_v26  ;;  %v1325_v31 = vadd.f32 %v1324_v28, %v1323_v27 }
 0x146   :  { %v1368_v32 = vpop.f32.mrb[11].mxu1 }
 0x147   :  { %v1369_v33 = vadd.f32 %v1368_v32, %v1367_v29  ;;  %v709_v34 = vadd.f32 %v1325_v31, %v1140_v0 }
 0x149   :  { %v794_v35 = vadd.f32 %v1369_v33, %v709_v34 }
 0x157   :  { %v1402_v36 = vpop.f32.mrb[12].mxu0 }
 0x158   :  { %v1403_v37 = vpop.f32.mrb[13].mxu0 }
 0x159   :  { %v1446_v38 = vpop.f32.mrb[12].mxu1  ;;  %v1404_v39 = vadd.f32 %v1403_v37, %v1402_v36 }
 0x15a   :  { %v1447_v40 = vpop.f32.mrb[13].mxu1 }
 0x15b   :  { %v1448_v41 = vadd.f32 %v1447_v40, %v1446_v38  ;;  %v864_v42 = vadd.f32 %v1404_v39, %v779_v13  ;;  %v1405_v43 = vpop.f32.mrb[14].mxu0  ;;  %v1020_v40 = vlaneseq }
 0x15c   :  { %v1406_v44 = vpop.f32.mrb[15].mxu0 }
 0x15d   :  { %v1449_v45 = vpop.f32.mrb[14].mxu1  ;;  %v949_v46 = vadd.f32 %v1448_v41, %v864_v42  ;;  %v1407_v47 = vadd.f32 %v1406_v44, %v1405_v43 }
 0x15e   :  { %v1450_v48 = vpop.f32.mrb[15].mxu1 }
 0x15f   :  { %v1451_v49 = vadd.f32 %v1450_v48, %v1449_v45  ;;  %v869_v50 = vadd.f32 %v1407_v47, %v784_v22  ;;  %v1408_v51 = vpop.f32.mrb[16].mxu0  ;;  %v967_v52 = vmul.f32 %v949_v46, %v949_v46  ;;  %v1023_v47 = vshrl.u32 %v1020_v40, 7 }
 0x160   :  { %v1409_v53 = vpop.f32.mrb[17].mxu0 }
 0x161   :  { %v1452_v54 = vpop.f32.mrb[16].mxu1  ;;  %v954_v55 = vadd.f32 %v1451_v49, %v869_v50  ;;  %v1410_v57 = vadd.f32 %v1409_v53, %v1408_v51  ;;  %v971_v59 = vsel %vm453_vm0, %v967_v52, 0.0 }
 0x162   :  { %v1453_v58 = vpop.f32.mrb[17].mxu1  ;;  %972 = vadd.xlane.f32.xlu0 %v971_v59 }
 0x163   :  { %v1454_v60 = vadd.f32 %v1453_v58, %v1452_v54  ;;  %v874_v61 = vadd.f32 %v1410_v57, %v789_v30  ;;  %v1411_v62 = vpop.f32.mrb[18].mxu0  ;;  %v968_v63 = vmul.f32 %v954_v55, %v954_v55 }
 0x164   :  { %v1412_v0 = vpop.f32.mrb[19].mxu0 }
 0x165   :  { %v1455_v1 = vpop.f32.mrb[18].mxu1  ;;  %v959_v2 = vadd.f32 %v1454_v60, %v874_v61  ;;  %v1413_v3 = vadd.f32 %v1412_v0, %v1411_v62  ;;  %v974_v5 = vsel %vm453_vm0, %v968_v63, 0.0 }
 0x166   :  { %v1456_v4 = vpop.f32.mrb[19].mxu1  ;;  %975 = vadd.xlane.f32.xlu1 %v974_v5 }
 0x167   :  { %v1457_v6 = vadd.f32 %v1456_v4, %v1455_v1  ;;  %v879_v7 = vadd.f32 %v1413_v3, %v794_v35  ;;  %v969_v8 = vmul.f32 %v959_v2, %v959_v2 }
 0x169   :  { %v964_v9 = vadd.f32 %v1457_v6, %v879_v7  ;;  %v977_v10 = vsel %vm453_vm0, %v969_v8, 0.0 }
 0x16a   :  { %978 = vadd.xlane.f32.xlu1 %v977_v10 }
 0x16b   :  { %v970_v11 = vmul.f32 %v964_v9, %v964_v9 }
 0x16d   :  { %v980_v12 = vsel %vm453_vm0, %v970_v11, 0.0 }
 0x16e   :  { %981 = vadd.xlane.f32.xlu0 %v980_v12 }
 0x1af   :  { %v456_v13 = vpop.xlane.xlu0 %455 }
 0x1b0   :  { %v457_v14 = vmax.f32 %v456_v13, 1e-24 }
 0x1b2   :  { %1739 = vrsqrt.f32 %v457_v14 }
 0x1bc   :  { %v1740_v15 = vpop.eup %1739 }
 0x1bd   :  { %v459_v16 = vmul.f32 %v1740_v15, %v2693_v56 }
 0x1bf   :  { %1472 = vmatmul.mubr.msk.f32.vlgmr.msra.gmra.mrb[20].mxu0 %vm453_vm0, %v459_v16 }
 0x1ef   :  { %v973_v17 = vpop.xlane.xlu0 %972 }
 0x1f0   :  { %v983_v18 = vmax.f32 %v973_v17, 1e-24 }
 0x1f2   :  { %1741 = vrsqrt.f32 %v983_v18 }
 0x1f3   :  { %v976_v19 = vpop.xlane.xlu1 %975 }
 0x1f4   :  { %v984_v20 = vmax.f32 %v976_v19, 1e-24 }
 0x1f6   :  { %1743 = vrsqrt.f32 %v984_v20 }
 0x1f7   :  { %v979_v21 = vpop.xlane.xlu1 %978 }
 0x1f8   :  { %v985_v22 = vmax.f32 %v979_v21, 1e-24 }
 0x1fa   :  { %1745 = vrsqrt.f32 %v985_v22 }
 0x1fb   :  { %v982_v23 = vpop.xlane.xlu0 %981 }
 0x1fc   :  { %v1742_v24 = vpop.eup %1741  ;;  %v986_v25 = vmax.f32 %v982_v23, 1e-24 }
 0x1fd   :  { %v991_v26 = vmul.f32 %v1742_v24, %v949_v46  ;;  %v1021_v46 = vand.u32 127, %v1020_v40 }
 0x1fe   :  { %1747 = vrsqrt.f32 %v986_v25 }
 0x1ff   :  { %v996_v27 = vmul.f32 %v991_v26, %v459_v16  ;;  %995 = vst.msk [vmem:[%s2740_s7] sm:$0xff] %vm453_vm0, %v991_v26  ;;  %v1024_v50 = vsub.s32 %v1021_v46, %v1023_v47 }
 0x200   :  { %v1744_v56 = vpop.eup %1743 }
 0x201   :  { %v1000_v28 = vsel %vm453_vm0, %v996_v27, 0.0  ;;  %v992_v29 = vmul.f32 %v1744_v56, %v954_v55 }
 0x202   :  { %1001 = vadd.xlane.f32.xlu1 %v1000_v28 }
 0x203   :  { %v997_v30 = vmul.f32 %v992_v29, %v459_v16 }
 0x204   :  { %v1746_v31 = vpop.eup %1745 }
 0x205   :  { %v1003_v32 = vsel %vm453_vm0, %v997_v30, 0.0  ;;  %v993_v33 = vmul.f32 %v1746_v31, %v959_v2 }
 0x206   :  { %1004 = vadd.xlane.f32.xlu0 %v1003_v32 }
 0x207   :  { %v998_v34 = vmul.f32 %v993_v33, %v459_v16 }
 0x208   :  { %v1748_v35 = vpop.eup %1747 }
 0x209   :  { %v1006_v36 = vsel %vm453_vm0, %v998_v34, 0.0  ;;  %v994_v37 = vmul.f32 %v1748_v35, %v964_v9 }
 0x20a   :  { %1007 = vadd.xlane.f32.xlu1 %v1006_v36 }
 0x20b   :  { %v999_v38 = vmul.f32 %v994_v37, %v459_v16 }
 0x20d   :  { %v1009_v39 = vsel %vm453_vm0, %v999_v38, 0.0 }
 0x20e   :  { %1010 = vadd.xlane.f32.xlu0 %v1009_v39 }
 0x28f   :  { %v1002_v41 = vpop.xlane.xlu1 %1001 }
 0x290   :  { %v1012_v51 = vmul.f32 5.0, %v1002_v41 }
 0x292   :  { %v1120_v42 = vpop.f32.mrb[20].mxu0  ;;  %v1025_v57 = vrot.slane %v1012_v51, %v1024_v50 }
 0x293   :  { %v1124_v43 = vmul.f32 5.0, %v1120_v42  ;;  %v1473_v44 = vpop.f32.mrb[21].mxu0  ;;  %v1005_v45 = vpop.xlane.xlu0 %1004 }
 0x294   :  { %v1013_v48 = vmul.f32 5.0, %v1005_v45 }
 0x295   :  { %1126 = vst.msk [vmem:[%s2741_s9] sm:$0xff] %vm1125_vm2, %v1124_v43 }
 0x296   :  { %v1029_v53 = vrot.slane %v1013_v48, %v1024_v50 }
 0x297   :  { %v1008_v49 = vpop.xlane.xlu1 %1007 }
 0x298   :  { %v1014_v52 = vmul.f32 5.0, %v1008_v49  ;;  %v1039_v59 = vsel %vm1038_vm3, %v1029_v53, %v1025_v57 }
 0x29a   :  { %v1033_v54 = vrot.slane %v1014_v52, %v1024_v50 }
 0x29b   :  { %v1011_v55 = vpop.xlane.xlu0 %1010 }
 0x29c   :  { %v1015_v58 = vmul.f32 5.0, %v1011_v55  ;;  %v1041_v61 = vsel %vm1040_vm4, %v1033_v54, %v1039_v59 }
 0x29e   :  { %v1037_v60 = vrot.slane %v1015_v58, %v1024_v50 }
 0x2a0   :  { %v1043_v62 = vsel %vm1042_vm5, %v1037_v60, %v1041_v61 }
 0x2a1   :  { %1046 = vst.msk [vmem:[%s2742_s8] sm:$0xf] %vm1045_vm6, %v1043_v62 }

</bundles_post_ra>
